<compile_context>
chip_gen: v7x
topology: tpu7x:2x2x1
jax: 0.10.0
libtpu: 0.0.40
codegen_flags: <defaults>
</compile_context>

<pallas_src>
import functools

import jax
import jax.numpy as jnp
from jax.experimental import pallas as pl
from jax.experimental.pallas import tpu as pltpu


CS_PAD = 128   # stem channels padded to one full lane width
CH_PAD = 128   # head channels padded to one full lane width
NC_PAD = 128   # classifier output padded to one full lane width (lane-dense store)


def _round_up(x, m):
    return (x + m - 1) // m * m


def _act_dtype_for_device():
    """bf16 activation math on v6e/v7x (bf16 VPU/EUP); f32 elsewhere (v5e etc.)."""
    try:
        kind = jax.devices()[0].device_kind.lower()
    except Exception:
        return jnp.float32
    if "v6" in kind or "v7" in kind:
        return jnp.bfloat16
    return jnp.float32


# --------------------------------------------------------------------------
# Fused kernel: stem matmul (+folded-BN bias, SiLU), 1x1 head matmul
# (+folded-BN bias, SiLU), global-average-pool accumulation, and the
# classifier + sigmoid in the finalize branch.
# Grid = (B, HW_tiles).  HW is a reduction axis: a (1, CH_PAD) f32 VMEM scratch
# accumulator is zeroed at j==0; the classifier runs at the last j and writes a
# lane-dense (1, NC_PAD) probability block.  Intermediates never touch HBM.
# --------------------------------------------------------------------------
def _fused_forward_kernel(x_ref, ws_ref, bs_ref, wh_ref, bh_ref, wc_ref, bc_ref,
                          o_ref, acc_ref, *, t_hw, rem_rows, act_dtype):
    j = pl.program_id(1)
    n_j = pl.num_programs(1)

    @pl.when(j == 0)
    def _init():
        acc_ref[...] = jnp.zeros_like(acc_ref)

    # stem conv as im2col matmul (bf16 MXU, f32 accumulate) + folded-BN bias + SiLU
    y1 = (jnp.dot(x_ref[...], ws_ref[...], preferred_element_type=jnp.float32)
          + bs_ref[...]).astype(act_dtype)
    a1 = y1 * jax.nn.sigmoid(y1)

    # 1x1 conv_head (BN scale folded into weights) + bias + SiLU
    y2 = (jnp.dot(a1.astype(jnp.bfloat16), wh_ref[...],
                  preferred_element_type=jnp.float32)
          + bh_ref[...]).astype(act_dtype)
    a2 = (y2 * jax.nn.sigmoid(y2)).astype(jnp.float32)       # (t_hw, CH_PAD) f32

    @pl.when(j < n_j - 1)
    def _accumulate():
        acc_ref[...] += jnp.sum(a2, axis=0, keepdims=True)

    @pl.when(j == n_j - 1)
    def _finalize():
        a2m = a2
        if rem_rows != t_hw:
            # Only the last, partial tile contains garbage rows -> mask them.
            ridx = jax.lax.broadcasted_iota(jnp.int32, (t_hw, 1), 0)
            a2m = jnp.where(ridx < rem_rows, a2, 0.0)
        pooled = acc_ref[...] + jnp.sum(a2m, axis=0, keepdims=True)   # (1, CH_PAD)
        # classifier: 1/HW is folded into wc; padded lanes are zero-weighted.
        logits = (jnp.dot(pooled, wc_ref[...], preferred_element_type=jnp.float32)
                  + bc_ref[...])
        o_ref[...] = jax.nn.sigmoid(logits)                           # (1, NC_PAD)


def fused_forward(cols, ws, bs, wh, bh, wc, bc, *, hw, act_dtype):
    """cols: (B, HW, K_pad) bf16 im2col patches. Returns padded probs (B, NC_PAD) f32."""
    B, hw_arr, k_pad = cols.shape
    assert hw_arr == hw
    assert ws.shape == (k_pad, CS_PAD) and wh.shape == (CS_PAD, CH_PAD)
    assert wc.shape == (CH_PAD, NC_PAD)

    if hw <= 1024:
        t_hw = hw                    # full-extent block: always layout-legal
        n_hw = 1
    else:
        t_hw = 1024                  # multiple of 16 (bf16 sublane tile)
        n_hw = pl.cdiv(hw, t_hw)
    rem_rows = hw - (n_hw - 1) * t_hw

    out = pl.pallas_call(
        functools.partial(_fused_forward_kernel, t_hw=t_hw, rem_rows=rem_rows,
                          act_dtype=act_dtype),
        out_shape=jax.ShapeDtypeStruct((B, 1, NC_PAD), jnp.float32),
        grid=(B, n_hw),
        in_specs=[
            pl.BlockSpec((None, t_hw, k_pad), lambda b, j: (b, j, 0)),
            pl.BlockSpec((k_pad, CS_PAD), lambda b, j: (0, 0)),
            pl.BlockSpec((1, CS_PAD), lambda b, j: (0, 0)),
            pl.BlockSpec((CS_PAD, CH_PAD), lambda b, j: (0, 0)),
            pl.BlockSpec((1, CH_PAD), lambda b, j: (0, 0)),
            pl.BlockSpec((CH_PAD, NC_PAD), lambda b, j: (0, 0)),
            pl.BlockSpec((1, NC_PAD), lambda b, j: (0, 0)),
        ],
        out_specs=pl.BlockSpec((None, 1, NC_PAD), lambda b, j: (b, 0, 0)),
        scratch_shapes=[pltpu.VMEM((1, CH_PAD), jnp.float32)],
        compiler_params=pltpu.CompilerParams(
            dimension_semantics=("parallel", "arbitrary"),
            vmem_limit_bytes=32 * 1024 * 1024,
        ),
    )(cols, ws, bs, wh, bh, wc, bc)
    return out.reshape(B, NC_PAD)


# --------------------------------------------------------------------------
# Glue: TF-"SAME" im2col for the 3x3 / stride-2 stem conv (handles odd and even
# spatial sizes).  Patch order along K is (kh, kw, Cin).  Runs in bf16.
# --------------------------------------------------------------------------
def im2col_3x3_s2_tfsame(x_nhwc):
    B, H, W, C = x_nhwc.shape
    Ho, Wo = -(-H // 2), -(-W // 2)
    pad_h = max((Ho - 1) * 2 + 3 - H, 0)
    pad_w = max((Wo - 1) * 2 + 3 - W, 0)
    xp = jnp.pad(x_nhwc, ((0, 0),
                          (pad_h // 2, pad_h - pad_h // 2),
                          (pad_w // 2, pad_w - pad_w // 2),
                          (0, 0)))
    patches = []
    for ki in range(3):
        for kj in range(3):
            patches.append(
                jax.lax.slice(
                    xp,
                    (0, ki, kj, 0),
                    (B, ki + 2 * (Ho - 1) + 1, kj + 2 * (Wo - 1) + 1, C),
                    (1, 2, 2, 1),
                ))  # each (B, Ho, Wo, C)
    cols = jnp.stack(patches, axis=3)                  # (B, Ho, Wo, 9, C)
    return cols.reshape(B, Ho * Wo, 9 * C), (B, Ho, Wo)


# --------------------------------------------------------------------------
# Parameters: logical params, then fold BN scales (and the 1/HW pooling scale)
# into the matmul weights and zero-pad channels to 128 lanes.  Zero padding is
# numerically exact through SiLU and the classifier.
# --------------------------------------------------------------------------
def init_params(key, c_in=3, c_stem=32, c_head=64, num_classes=1):
    ks = jax.random.split(key, 8)
    return {
        # stem conv weight flattened as (kh*kw*Cin, C_stem), matching im2col order
        "w_stem": jax.random.normal(ks[0], (9 * c_in, c_stem), jnp.float32) * 0.1,
        "bn1_scale": 1.0 + 0.05 * jax.random.normal(ks[1], (c_stem,), jnp.float32),
        "bn1_bias": 0.05 * jax.random.normal(ks[2], (c_stem,), jnp.float32),
        "w_head": jax.random.normal(ks[3], (c_stem, c_head), jnp.float32) * 0.1,
        "bn2_scale": 1.0 + 0.05 * jax.random.normal(ks[4], (c_head,), jnp.float32),
        "bn2_bias": 0.05 * jax.random.normal(ks[5], (c_head,), jnp.float32),
        "w_cls": jax.random.normal(ks[6], (c_head, num_classes), jnp.float32) * 0.1,
        "b_cls": 0.01 * jax.random.normal(ks[7], (num_classes,), jnp.float32),
    }


def fold_and_pad_params(p, *, k_pad, inv_hw):
    k, cs = p["w_stem"].shape
    cs2, ch = p["w_head"].shape
    ch2, nc = p["w_cls"].shape
    assert cs == cs2 and ch == ch2

    ws = p["w_stem"] * p["bn1_scale"][None, :]                      # fold BN1 scale
    ws = jnp.pad(ws, ((0, k_pad - k), (0, CS_PAD - cs))).astype(jnp.bfloat16)
    bs = jnp.pad(p["bn1_bias"], (0, CS_PAD - cs)).reshape(1, CS_PAD)

    wh = p["w_head"] * p["bn2_scale"][None, :]                      # fold BN2 scale
    wh = jnp.pad(wh, ((0, CS_PAD - cs), (0, CH_PAD - ch))).astype(jnp.bfloat16)
    bh = jnp.pad(p["bn2_bias"], (0, CH_PAD - ch)).reshape(1, CH_PAD)

    wc = jnp.pad(p["w_cls"] * inv_hw,                               # fold 1/HW pool scale
                 ((0, CH_PAD - ch), (0, NC_PAD - nc)))
    bc = jnp.pad(p["b_cls"], (0, NC_PAD - nc)).reshape(1, NC_PAD)
    return {"ws": ws, "bs": bs, "wh": wh, "bh": bh, "wc": wc, "bc": bc}


# --------------------------------------------------------------------------
# Full forward: equivalent of TimmModel.forward(x) with activate=True,
# with_features=False, num_classes=1 -> sigmoid probability.
# --------------------------------------------------------------------------
def timm_model_forward(x_nchw, params):
    act_dtype = _act_dtype_for_device()
    num_classes = params["w_cls"].shape[1]

    x = jnp.transpose(x_nchw, (0, 2, 3, 1)).astype(jnp.bfloat16)    # NCHW -> NHWC, bf16
    cols, (B, Ho, Wo) = im2col_3x3_s2_tfsame(x)                     # (B, HW, 9*Cin) bf16
    hw = Ho * Wo
    k = cols.shape[-1]
    k_pad = _round_up(k, 32)
    cols = jnp.pad(cols, ((0, 0), (0, 0), (0, k_pad - k)))          # fuses with im2col

    pp = fold_and_pad_params(params, k_pad=k_pad, inv_hw=1.0 / hw)
    probs_pad = fused_forward(cols, pp["ws"], pp["bs"], pp["wh"], pp["bh"],
                              pp["wc"], pp["bc"], hw=hw, act_dtype=act_dtype)
    return probs_pad[:, :num_classes]                               # (B, num_classes)


if __name__ == "__main__":
    key = jax.random.PRNGKey(0)
    kx, kp = jax.random.split(key)

    # Small NCHW image input consistent with a conv backbone: (B=2, C=3, H=16, W=16)
    x = jax.random.normal(kx, (2, 3, 16, 16), jnp.float32)
    params = init_params(kp)

    fwd = jax.jit(timm_model_forward)
    out = jax.block_until_ready(fwd(x, params))                     # (2, 1) probabilities

    assert out.shape == (2, 1)
    assert out.dtype == jnp.float32
    assert bool(jnp.all((out >= 0.0) & (out <= 1.0)))
    print("KERNEL_OK")
</pallas_src>

<mosaic_0001>
module attributes {stable_mosaic.version = 11 : i64} {
  func.func @_fused_forward_kernel(%arg0: i32, %arg1: i32, %arg2: memref<1x64x32xbf16, #tpu.memory_space<vmem>>, %arg3: memref<32x128xbf16, #tpu.memory_space<vmem>>, %arg4: memref<1x128xf32, #tpu.memory_space<vmem>>, %arg5: memref<128x128xbf16, #tpu.memory_space<vmem>>, %arg6: memref<1x128xf32, #tpu.memory_space<vmem>>, %arg7: memref<128x128xf32, #tpu.memory_space<vmem>>, %arg8: memref<1x128xf32, #tpu.memory_space<vmem>>, %arg9: memref<1x1x128xf32, #tpu.memory_space<vmem>>, %arg10: memref<1x128xf32, #tpu.memory_space<vmem>>) attributes {dimension_semantics = [#tpu.dimension_semantics<parallel>, #tpu.dimension_semantics<arbitrary>], iteration_bounds = array<i64: 2, 1>, scalar_prefetch = 0 : i64, scratch_operands = 1 : i64, tpu.core_type = #tpu.core_type<tc>, window_params = [{transform_indices = @transform_0, window_bounds = array<i64: 1, 64, 32>}, {pipeline_mode = #tpu.pipeline_mode<synchronous>, transform_indices = @transform_1, window_bounds = array<i64: 32, 128>}, {pipeline_mode = #tpu.pipeline_mode<synchronous>, transform_indices = @transform_2, window_bounds = array<i64: 1, 128>}, {pipeline_mode = #tpu.pipeline_mode<synchronous>, transform_indices = @transform_3, window_bounds = array<i64: 128, 128>}, {pipeline_mode = #tpu.pipeline_mode<synchronous>, transform_indices = @transform_4, window_bounds = array<i64: 1, 128>}, {pipeline_mode = #tpu.pipeline_mode<synchronous>, transform_indices = @transform_5, window_bounds = array<i64: 128, 128>}, {pipeline_mode = #tpu.pipeline_mode<synchronous>, transform_indices = @transform_6, window_bounds = array<i64: 1, 128>}, {transform_indices = @transform_7, window_bounds = array<i64: 1, 1, 128>}]} {
    %c0_i32 = arith.constant 0 : i32
    %0 = arith.cmpi eq, %arg1, %c0_i32 : i32
    %1 = arith.extui %0 : i1 to i32
    %c0_i32_0 = arith.constant 0 : i32
    %2 = arith.cmpi ne, %1, %c0_i32_0 : i32
    scf.if %2 {
      %cst_18 = arith.constant 0.000000e+00 : f32
      %34 = vector.broadcast %cst_18 : f32 to vector<1x128xf32>
      %c0_19 = arith.constant 0 : index
      %c0_20 = arith.constant 0 : index
      %35 = vector.load %arg10[%c0_19, %c0_20] : memref<1x128xf32, #tpu.memory_space<vmem>>, vector<1x128xf32>
      tpu.vector_store %arg10[%c0_19, %c0_20], %34 {strides = array<i32>} : memref<1x128xf32, #tpu.memory_space<vmem>>, vector<1x128xf32>,
    } else {
    }
    %c0 = arith.constant 0 : index
    %c0_1 = arith.constant 0 : index
    %c0_2 = arith.constant 0 : index
    %3 = vector.load %arg2[%c0, %c0_1, %c0_2] : memref<1x64x32xbf16, #tpu.memory_space<vmem>>, vector<1x64x32xbf16>
    %4 = vector.shape_cast %3 : vector<1x64x32xbf16> to vector<64x32xbf16>
    %c0_3 = arith.constant 0 : index
    %c0_4 = arith.constant 0 : index
    %5 = vector.load %arg3[%c0_3, %c0_4] : memref<32x128xbf16, #tpu.memory_space<vmem>>, vector<32x128xbf16>
    %cst = arith.constant dense<0.000000e+00> : vector<64x128xf32>
    %6 = tpu.matmul %4, %5, %cst {dimension_numbers = #tpu.dot_dimension_numbers<[1], [0], [0], [1], [0, 0, 1, 1], [], []>} : vector<64x32xbf16>, vector<32x128xbf16>, vector<64x128xf32> -> vector<64x128xf32>
    %c0_5 = arith.constant 0 : index
    %c0_6 = arith.constant 0 : index
    %7 = vector.load %arg4[%c0_5, %c0_6] : memref<1x128xf32, #tpu.memory_space<vmem>>, vector<1x128xf32>
    %8 = vector.broadcast %7 : vector<1x128xf32> to vector<64x128xf32>
    %9 = arith.addf %6, %8 : vector<64x128xf32>
    %10 = arith.negf %9 : vector<64x128xf32>
    %11 = math.exp %10 : vector<64x128xf32>
    %cst_7 = arith.constant 1.000000e+00 : f32
    %12 = vector.broadcast %cst_7 : f32 to vector<64x128xf32>
    %13 = arith.addf %12, %11 : vector<64x128xf32>
    %14 = arith.divf %12, %13 : vector<64x128xf32>
    %15 = arith.mulf %9, %14 : vector<64x128xf32>
    %16 = arith.truncf %15 : vector<64x128xf32> to vector<64x128xbf16>
    %c0_8 = arith.constant 0 : index
    %c0_9 = arith.constant 0 : index
    %17 = vector.load %arg5[%c0_8, %c0_9] : memref<128x128xbf16, #tpu.memory_space<vmem>>, vector<128x128xbf16>
    %cst_10 = arith.constant dense<0.000000e+00> : vector<64x128xf32>
    %18 = tpu.matmul %16, %17, %cst_10 {dimension_numbers = #tpu.dot_dimension_numbers<[1], [0], [0], [1], [0, 0, 1, 1], [], []>} : vector<64x128xbf16>, vector<128x128xbf16>, vector<64x128xf32> -> vector<64x128xf32>
    %c0_11 = arith.constant 0 : index
    %c0_12 = arith.constant 0 : index
    %19 = vector.load %arg6[%c0_11, %c0_12] : memref<1x128xf32, #tpu.memory_space<vmem>>, vector<1x128xf32>
    %20 = vector.broadcast %19 : vector<1x128xf32> to vector<64x128xf32>
    %21 = arith.addf %18, %20 : vector<64x128xf32>
    %22 = arith.negf %21 : vector<64x128xf32>
    %23 = math.exp %22 : vector<64x128xf32>
    %cst_13 = arith.constant 1.000000e+00 : f32
    %24 = vector.broadcast %cst_13 : f32 to vector<64x128xf32>
    %25 = arith.addf %24, %23 : vector<64x128xf32>
    %26 = arith.divf %24, %25 : vector<64x128xf32>
    %27 = arith.mulf %21, %26 : vector<64x128xf32>
    %c0_i32_14 = arith.constant 0 : i32
    %28 = arith.cmpi slt, %arg1, %c0_i32_14 : i32
    %29 = arith.extui %28 : i1 to i32
    %c0_i32_15 = arith.constant 0 : i32
    %30 = arith.cmpi ne, %29, %c0_i32_15 : i32
    scf.if %30 {
      %c0_18 = arith.constant 0 : index
      %c0_19 = arith.constant 0 : index
      %34 = vector.load %arg10[%c0_18, %c0_19] : memref<1x128xf32, #tpu.memory_space<vmem>>, vector<1x128xf32>
      %cst_20 = arith.constant dense<0.000000e+00> : vector<128xf32>
      %35 = vector.multi_reduction <add>, %27, %cst_20 [0] : vector<64x128xf32> to vector<128xf32>
      %36 = vector.shape_cast %35 : vector<128xf32> to vector<1x128xf32>
      %37 = arith.addf %34, %36 : vector<1x128xf32>
      %c0_21 = arith.constant 0 : index
      %c0_22 = arith.constant 0 : index
      %38 = vector.load %arg10[%c0_21, %c0_22] : memref<1x128xf32, #tpu.memory_space<vmem>>, vector<1x128xf32>
      tpu.vector_store %arg10[%c0_21, %c0_22], %37 {strides = array<i32>} : memref<1x128xf32, #tpu.memory_space<vmem>>, vector<1x128xf32>,
    } else {
    }
    %c0_i32_16 = arith.constant 0 : i32
    %31 = arith.cmpi eq, %arg1, %c0_i32_16 : i32
    %32 = arith.extui %31 : i1 to i32
    %c0_i32_17 = arith.constant 0 : i32
    %33 = arith.cmpi ne, %32, %c0_i32_17 : i32
    scf.if %33 {
      %c0_18 = arith.constant 0 : index
      %c0_19 = arith.constant 0 : index
      %34 = vector.load %arg10[%c0_18, %c0_19] : memref<1x128xf32, #tpu.memory_space<vmem>>, vector<1x128xf32>
      %cst_20 = arith.constant dense<0.000000e+00> : vector<128xf32>
      %35 = vector.multi_reduction <add>, %27, %cst_20 [0] : vector<64x128xf32> to vector<128xf32>
      %36 = vector.shape_cast %35 : vector<128xf32> to vector<1x128xf32>
      %37 = arith.addf %34, %36 : vector<1x128xf32>
      %c0_21 = arith.constant 0 : index
      %c0_22 = arith.constant 0 : index
      %38 = vector.load %arg7[%c0_21, %c0_22] : memref<128x128xf32, #tpu.memory_space<vmem>>, vector<128x128xf32>
      %cst_23 = arith.constant dense<0.000000e+00> : vector<1x128xf32>
      %39 = tpu.matmul %37, %38, %cst_23 {dimension_numbers = #tpu.dot_dimension_numbers<[1], [0], [0], [1], [0, 0, 1, 1], [], []>} : vector<1x128xf32>, vector<128x128xf32>, vector<1x128xf32> -> vector<1x128xf32>
      %c0_24 = arith.constant 0 : index
      %c0_25 = arith.constant 0 : index
      %40 = vector.load %arg8[%c0_24, %c0_25] : memref<1x128xf32, #tpu.memory_space<vmem>>, vector<1x128xf32>
      %41 = arith.addf %39, %40 : vector<1x128xf32>
      %42 = arith.negf %41 : vector<1x128xf32>
      %43 = math.exp %42 : vector<1x128xf32>
      %cst_26 = arith.constant 1.000000e+00 : f32
      %44 = vector.broadcast %cst_26 : f32 to vector<1x128xf32>
      %45 = arith.addf %44, %43 : vector<1x128xf32>
      %46 = arith.divf %44, %45 : vector<1x128xf32>
      %c0_27 = arith.constant 0 : index
      %c0_28 = arith.constant 0 : index
      %c0_29 = arith.constant 0 : index
      %47 = vector.load %arg9[%c0_27, %c0_28, %c0_29] : memref<1x1x128xf32, #tpu.memory_space<vmem>>, vector<1x1x128xf32>
      %48 = vector.shape_cast %47 : vector<1x1x128xf32> to vector<1x128xf32>
      %49 = vector.shape_cast %46 : vector<1x128xf32> to vector<1x1x128xf32>
      tpu.vector_store %arg9[%c0_27, %c0_28, %c0_29], %49 {strides = array<i32>} : memref<1x1x128xf32, #tpu.memory_space<vmem>>, vector<1x1x128xf32>,
    } else {
    }
    return
  }
  func.func @transform_0(%arg0: i32, %arg1: i32) -> (i32, i32, i32) {
    %c0_i32 = arith.constant 0 : i32
    %c0_i32_0 = arith.constant 0 : i32
    return %arg0, %arg1, %c0_i32 : i32, i32, i32
  }
  func.func @transform_1(%arg0: i32, %arg1: i32) -> (i32, i32) {
    %c0_i32 = arith.constant 0 : i32
    %c0_i32_0 = arith.constant 0 : i32
    %c0_i32_1 = arith.constant 0 : i32
    return %c0_i32, %c0_i32_0 : i32, i32
  }
  func.func @transform_2(%arg0: i32, %arg1: i32) -> (i32, i32) {
    %c0_i32 = arith.constant 0 : i32
    %c0_i32_0 = arith.constant 0 : i32
    %c0_i32_1 = arith.constant 0 : i32
    return %c0_i32, %c0_i32_0 : i32, i32
  }
  func.func @transform_3(%arg0: i32, %arg1: i32) -> (i32, i32) {
    %c0_i32 = arith.constant 0 : i32
    %c0_i32_0 = arith.constant 0 : i32
    %c0_i32_1 = arith.constant 0 : i32
    return %c0_i32, %c0_i32_0 : i32, i32
  }
  func.func @transform_4(%arg0: i32, %arg1: i32) -> (i32, i32) {
    %c0_i32 = arith.constant 0 : i32
    %c0_i32_0 = arith.constant 0 : i32
    %c0_i32_1 = arith.constant 0 : i32
    return %c0_i32, %c0_i32_0 : i32, i32
  }
  func.func @transform_5(%arg0: i32, %arg1: i32) -> (i32, i32) {
    %c0_i32 = arith.constant 0 : i32
    %c0_i32_0 = arith.constant 0 : i32
    %c0_i32_1 = arith.constant 0 : i32
    return %c0_i32, %c0_i32_0 : i32, i32
  }
  func.func @transform_6(%arg0: i32, %arg1: i32) -> (i32, i32) {
    %c0_i32 = arith.constant 0 : i32
    %c0_i32_0 = arith.constant 0 : i32
    %c0_i32_1 = arith.constant 0 : i32
    return %c0_i32, %c0_i32_0 : i32, i32
  }
  func.func @transform_7(%arg0: i32, %arg1: i32) -> (i32, i32, i32) {
    %c0_i32 = arith.constant 0 : i32
    %c0_i32_0 = arith.constant 0 : i32
    %c0_i32_1 = arith.constant 0 : i32
    return %arg0, %c0_i32, %c0_i32_0 : i32, i32, i32
  }
}

</mosaic_0001>

<bundles_post_ra>
// kernel: timm_model_forward.1
= control target key start
LH: loop header
LB: loop body
LE: loop exit
PB: predicated region body
PF: predicated region fallthrough
CT: control target
= control target key end

     0   :  { %s1236_s24 = smov 0   ;;  %s1238_s25 = smov 0   ;;  %s1360_s0 = inlined_call_operand.vmem [shape: bf16[2,64,32], index: 0, kind: input, shape index: {}]   ;;  %s1361_s1 = inlined_call_operand.vmem [shape: bf16[32,128], index: 1, kind: input, shape index: {}]   ;;  %s1362_s2 = inlined_call_operand.vmem [shape: f32[1,128], index: 2, kind: input, shape index: {}]   ;;  %s1363_s3 = inlined_call_operand.vmem [shape: bf16[128,128], index: 3, kind: input, shape index: {}]   ;;  %s1364_s4 = inlined_call_operand.vmem [shape: f32[1,128], index: 4, kind: input, shape index: {}]   ;;  %s1365_s5 = inlined_call_operand.vmem [shape: f32[128,128], index: 5, kind: input, shape index: {}]   ;;  %s1366_s6 = inlined_call_operand.vmem [shape: f32[1,128], index: 6, kind: input, shape index: {}]   ;;  %s1367_s7 = inlined_call_operand.vmem [shape: f32[2,1,128], index: 7, kind: output, shape index: {}]  }
   0x1   :  { %s1240_s26 = smov 0  }
   0x2 LB: > { %s29_s27 = sadd.s32 1, %s1187_s25  ;;  %p887_p0 = scmp.ge.s32.totalorder %s1191_s26, 1  ;;  %s1191_s26 = sphi %s1240_s26, %s17_s26   ;;  %s1187_s25 = sphi %s1238_s25, %s1369_s25   ;;  %s1183_s24 = sphi %s1236_s24, %s1368_s24  }
   0x3   : > { %p31_p1 = scmp.ge.s32.totalorder %s29_s27, 2  ;;  %p256_p2 = scmp.lt.s32.totalorder %s1191_s26, 3 }
   0x5   : > { %s1371_s27 = smov (%p31_p1, %s29_s27), 0  ;;  %p257_p3 = pnand %p887_p0, %p256_p2 }
   0x6   : > { %v1087_v0 = vld [vmem:[%s1361_s1] sm:$0xff] (!%p257_p3)   ;;  %p291_p4 = scmp.lt.s32.totalorder (!%p257_p3), %s1183_s24, 1  ;;  %v1088_v1 = vld [vmem:[%s1361_s1 + $0x8] sm:$0xff] (!%p257_p3)   ;;  %vm360_vm0 = vcmask (!%p257_p3), 261120   ;;  %v1095_v8 = vld [vmem:[%s1363_s3 + $0x10] sm:$0xff] (!%p257_p3)   ;;  %vm1195_vm1 = vmmov (!%p257_p3), 0  }
   0x7   : > { %260 = sbr.rel (%p257_p3) target bundleno = 781 (0x30d), region = 48  ;;  %965 = vmatprep.subr.bf16.mxu0 (!%p257_p3), %v1087_v0  ;;  %v1093_v6 = vld [vmem:[%s1363_s3] sm:$0xff] (!%p257_p3)   ;;  %v1094_v7 = vld [vmem:[%s1363_s3 + $0x8] sm:$0xff] (!%p257_p3)   ;;  %v1096_v9 = vld [vmem:[%s1363_s3 + $0x18] sm:$0xff] (!%p257_p3)  }
   0x8   : > { %966 = vmatpush3.bf16.msra.mxu0 (!%p257_p3), %v1087_v0  ;;  %977 = vmatprep.subr.bf16.mxu1 (!%p257_p3), %v1093_v6  ;;  %v1097_v10 = vld [vmem:[%s1363_s3 + $0x20] sm:$0xff] (!%p257_p3)   ;;  %v1098_v11 = vld [vmem:[%s1363_s3 + $0x28] sm:$0xff] (!%p257_p3)   ;;  %v1099_v12 = vld [vmem:[%s1363_s3 + $0x30] sm:$0xff] (!%p257_p3)  }
   0x9   : > { %967 = vmatprep.subr.bf16.mxu0 (!%p257_p3), %v1088_v1  ;;  %978 = vmatpush3.bf16.msra.mxu1 (!%p257_p3), %v1093_v6  ;;  %v1100_v13 = vld [vmem:[%s1363_s3 + $0x38] sm:$0xff] (!%p257_p3)   ;;  %v890_v14 = vld [vmem:[%s1362_s2] ss:$0 sm:$0xff] (!%p257_p3) }
   0xa   : > { %979 = vmatprep.subr.bf16.mxu1 (!%p257_p3), %v1094_v7 }
   0xc   : > { %968 = vmatpush3.bf16.msra.mxu0 (!%p257_p3), %v1088_v1 }
   0xd   : > { %980 = vmatpush3.bf16.msra.mxu1 (!%p257_p3), %v1094_v7 }
   0xe   : > { %s1373_s24 = smov (!%p291_p4, %s1183_s24), 1  ;;  %981 = vmatprep.subr.bf16.mxu1 %v1095_v8 }
   0xf   : > { %s929_s9 = sshll.u32 %s1373_s24, 5 }
  0x10   : > { %s298_s12 = scalar_lea.vmem %s1360_s0, %s929_s9 }
  0x11   : > { %v1089_v2 = vld [vmem:[%s298_s12] sm:$0xff]   ;;  %v1090_v3 = vld [vmem:[%s298_s12 + $0x8] sm:$0xff]   ;;  %v1091_v4 = vld [vmem:[%s298_s12 + $0x10] sm:$0xff]   ;;  %982 = vmatpush3.bf16.msra.mxu1 %v1095_v8 }
  0x12   : > { %969 = vmatprep.mubr.msk.bf16.mxu0 %vm360_vm0, %v1089_v2  ;;  %v1092_v5 = vld [vmem:[%s298_s12 + $0x18] sm:$0xff]   ;;  %983 = vmatprep.subr.bf16.mxu1 %v1096_v9  ;;  %s302_s12 = scalar_lea.vmem %s1367_s7, %s1373_s24 }
  0x13   : > { %970 = vmatmul.mubr.msk.bf16.vlgmr.msra.gmra.mrb[0].mxu0 %vm360_vm0, %v1090_v3 }
  0x14   : > { %973 = vmatprep.mubr.msk.bf16.mxu0 %vm360_vm0, %v1091_v4 }
  0x15   : > { %984 = vmatpush3.bf16.msra.mxu1 %v1096_v9 }
  0x16   : > { %985 = vmatprep.subr.bf16.mxu1 %v1097_v10 }
  0x19   : > { %986 = vmatpush3.bf16.msra.mxu1 %v1097_v10 }
  0x1a   : > { %987 = vmatprep.subr.bf16.mxu1 %v1098_v11 }
  0x1b   : > { %974 = vmatmul.mubr.msk.bf16.gmra.mrb[4].mxu0 %vm360_vm0, %v1092_v5 }
  0x1d   : > { %988 = vmatpush3.bf16.msra.mxu1 %v1098_v11  ;;  %v728_v11 = vld [vmem:[%s1365_s5] sm:$0xff] }
  0x1e   : > { %989 = vmatprep.subr.bf16.mxu1 %v1099_v12 }
  0x21   : > { %990 = vmatpush3.bf16.msra.mxu1 %v1099_v12  ;;  %v729_v12 = vld [vmem:[%s1365_s5 + $0x8] sm:$0xff] }
  0x22   : > { %991 = vmatprep.subr.bf16.mxu1 %v1100_v13 }
  0x25   : > { %992 = vmatpush3.bf16.msra.mxu1 %v1100_v13  ;;  %v1037_v13 = vpack.c.bf16 %v729_v12, %v728_v11 }
  0xe6   : > { %v971_v15 = vpop.f32.mrb[0].mxu0 }
  0xe7   : > { %v416_v16 = vadd.f32 %v971_v15, %v890_v14  ;;  %v407_v17 = vpop.f32.mrb[1].mxu0  ;;  %v730_v15 = vld [vmem:[%s1365_s5 + $0x10] sm:$0xff] }
  0xe8   : > { %v408_v18 = vadd.f32 %v890_v14, %v407_v17  ;;  %v972_v19 = vpop.f32.mrb[2].mxu0 }
  0xe9   : > { %v903_v20 = vmul.f32 -1.442695, %v416_v16  ;;  %v419_v21 = vadd.f32 %v972_v19, %v890_v14  ;;  %v410_v22 = vpop.f32.mrb[3].mxu0  ;;  %v733_v19 = vld [vmem:[%s1365_s5 + $0x28] sm:$0xff] }
  0xea   : > { %v901_v23 = vmul.f32 -1.442695, %v408_v18  ;;  %v411_v24 = vadd.f32 %v890_v14, %v410_v22  ;;  %v735_v22 = vld [vmem:[%s1365_s5 + $0x38] sm:$0xff] }
  0xeb   : > { %1101 = vpow2.f32 %v903_v20  ;;  %v904_v25 = vmul.f32 -1.442695, %v419_v21 }
  0xec   : > { %1103 = vpow2.f32 %v901_v23  ;;  %v902_v26 = vmul.f32 -1.442695, %v411_v24 }
  0xed   : > { %1105 = vpow2.f32 %v904_v25  ;;  %v737_v25 = vld [vmem:[%s1365_s5 + $0x48] sm:$0xff] }
  0xee   : > { %1107 = vpow2.f32 %v902_v26  ;;  %v975_v27 = vpop.f32.mrb[4].mxu0 }
  0xef   : > { %v432_v28 = vadd.f32 %v975_v27, %v890_v14  ;;  %v423_v29 = vpop.f32.mrb[5].mxu0  ;;  %v738_v27 = vld [vmem:[%s1365_s5 + $0x50] sm:$0xff] }
  0xf0   : > { %v424_v30 = vadd.f32 %v890_v14, %v423_v29  ;;  %v976_v31 = vpop.f32.mrb[6].mxu0 }
  0xf1   : > { %v907_v32 = vmul.f32 -1.442695, %v432_v28  ;;  %v435_v33 = vadd.f32 %v976_v31, %v890_v14  ;;  %v426_v34 = vpop.f32.mrb[7].mxu0  ;;  %v741_v31 = vld [vmem:[%s1365_s5 + $0x68] sm:$0xff] }
  0xf2   : > { %v905_v35 = vmul.f32 -1.442695, %v424_v30  ;;  %v427_v36 = vadd.f32 %v890_v14, %v426_v34  ;;  %v1193_v14 = vmov 0.0|0.0   ;;  %v742_v34 = vld [vmem:[%s1365_s5 + $0x70] sm:$0xff] }
  0xf3   : > { %1109 = vpow2.f32 %v907_v32  ;;  %v908_v37 = vmul.f32 -1.442695, %v435_v33  ;;  %1036 = vmatprep.subr.bf16.mxu0 %v1193_v14  ;;  %v1194_v32 = vmov 0.0  }
  0xf4   : > { %1111 = vpow2.f32 %v905_v35  ;;  %v906_v38 = vmul.f32 -1.442695, %v427_v36  ;;  %1038 = vmatpush3.bf16.msra.mxu0 %v1037_v13  ;;  %308 = vst [vmem:[#allocation2] sm:$0x1] %v1194_v32  ;;  %v743_v35 = vld [vmem:[%s1365_s5 + $0x78] sm:$0xff]  ;;  %1033 = vmatprep.mubr.msk.f32.mxu0 %vm1195_vm1, %v1194_v32 }
  0xf5   : > { %v1102_v39 = vpop.eup %1101  ;;  %1113 = vpow2.f32 %v908_v37  ;;  %1039 = vmatprep.subr.bf16.mxu0 %v1193_v14  ;;  %v909_v37 = vld [vmem:[%s1364_s4] ss:$0 sm:$0xff] }
  0xf6   : > { %v1104_v40 = vpop.eup %1103  ;;  %v464_v41 = vadd.f32 1.0, %v1102_v39  ;;  %1115 = vpow2.f32 %v906_v38 }
  0xf7   : > { %v1106_v42 = vpop.eup %1105  ;;  %v462_v43 = vadd.f32 1.0, %v1104_v40 }
  0xf8   : > { %v1108_v44 = vpop.eup %1107  ;;  %1117 = vrcp.f32 %v464_v41  ;;  %v465_v45 = vadd.f32 1.0, %v1106_v42 }
  0xf9   : > { %1119 = vrcp.f32 %v462_v43  ;;  %v463_v46 = vadd.f32 1.0, %v1108_v44 }
  0xfa   : > { %1121 = vrcp.f32 %v465_v45 }
  0xfb   : > { %1123 = vrcp.f32 %v463_v46 }
  0xfd   : > { %v1110_v47 = vpop.eup %1109 }
  0xfe   : > { %v1112_v48 = vpop.eup %1111  ;;  %v468_v49 = vadd.f32 1.0, %v1110_v47 }
  0xff   : > { %v1114_v50 = vpop.eup %1113  ;;  %v466_v51 = vadd.f32 1.0, %v1112_v48 }
 0x100   : > { %v1116_v52 = vpop.eup %1115  ;;  %1125 = vrcp.f32 %v468_v49  ;;  %v469_v53 = vadd.f32 1.0, %v1114_v50 }
 0x101   : > { %1127 = vrcp.f32 %v466_v51  ;;  %v467_v54 = vadd.f32 1.0, %v1116_v52 }
 0x102   : > { %v1118_v55 = vpop.eup %1117  ;;  %1129 = vrcp.f32 %v469_v53 }
 0x103   : > { %v1120_v56 = vpop.eup %1119  ;;  %1131 = vrcp.f32 %v467_v54  ;;  %v488_v59 = vmul.f32 %v1118_v55, %v416_v16  ;;  %v731_v16 = vld [vmem:[%s1365_s5 + $0x18] sm:$0xff] }
 0x104   : > { %v1122_v57 = vpop.eup %1121  ;;  %v486_v61 = vmul.f32 %v1120_v56, %v408_v18  ;;  %v1040_v17 = vpack.c.bf16 %v731_v16, %v730_v15  ;;  %v732_v18 = vld [vmem:[%s1365_s5 + $0x20] sm:$0xff] }
 0x105   : > { %v1124_v58 = vpop.eup %1123  ;;  %v489_v60 = vmul.f32 %v1122_v57, %v419_v21  ;;  %v1043_v20 = vpack.c.bf16 %v733_v19, %v732_v18  ;;  %v734_v21 = vld [vmem:[%s1365_s5 + $0x30] sm:$0xff] }
 0x106   : > { %v487_v62 = vmul.f32 %v1124_v58, %v411_v24  ;;  %1041 = vmatpush3.bf16.msra.mxu0 %v1040_v17  ;;  %v1046_v23 = vpack.c.bf16 %v735_v22, %v734_v21  ;;  %v736_v24 = vld [vmem:[%s1365_s5 + $0x40] sm:$0xff] }
 0x107   : > { %v495_v63 = vpack.c.bf16 %v489_v60, %v488_v59  ;;  %1042 = vmatprep.subr.bf16.mxu0 %v1193_v14  ;;  %v1049_v26 = vpack.c.bf16 %v737_v25, %v736_v24 }
 0x108   : > { %v494_v0 = vpack.c.bf16 %v487_v62, %v486_v61 }
 0x10a   : > { %v1126_v1 = vpop.eup %1125  ;;  %993 = vmatprep.mubr.bf16.mxu1 %v494_v0  ;;  %1044 = vmatpush3.bf16.msra.mxu0 %v1043_v20 }
 0x10b   : > { %v1128_v2 = vpop.eup %1127  ;;  %994 = vmatmul.mubr.bf16.vlgmr.msra.gmra.mrb[0].mxu1 %v495_v63  ;;  %v492_v5 = vmul.f32 %v1126_v1, %v432_v28  ;;  %1045 = vmatprep.subr.bf16.mxu0 %v1193_v14  ;;  %v739_v28 = vld [vmem:[%s1365_s5 + $0x58] sm:$0xff] }
 0x10c   : > { %v1130_v3 = vpop.eup %1129  ;;  %v490_v7 = vmul.f32 %v1128_v2, %v424_v30  ;;  %v1052_v29 = vpack.c.bf16 %v739_v28, %v738_v27  ;;  %v740_v30 = vld [vmem:[%s1365_s5 + $0x60] sm:$0xff] }
 0x10d   : > { %v1132_v4 = vpop.eup %1131  ;;  %v493_v6 = vmul.f32 %v1130_v3, %v435_v33  ;;  %v1055_v33 = vpack.c.bf16 %v741_v31, %v740_v30 }
 0x10e   : > { %v491_v8 = vmul.f32 %v1132_v4, %v427_v36  ;;  %1047 = vmatpush3.bf16.msra.mxu0 %v1046_v23  ;;  %v1058_v36 = vpack.c.bf16 %v743_v35, %v742_v34 }
 0x10f   : > { %v497_v9 = vpack.c.bf16 %v493_v6, %v492_v5  ;;  %1048 = vmatprep.subr.bf16.mxu0 %v1193_v14 }
 0x110   : > { %v496_v10 = vpack.c.bf16 %v491_v8, %v490_v7 }
 0x112   : > { %997 = vmatprep.mubr.bf16.mxu1 %v496_v10  ;;  %1050 = vmatpush3.bf16.msra.mxu0 %v1049_v26 }
 0x113   : > { %998 = vmatmul.mubr.bf16.gmra.mrb[4].mxu1 %v497_v9  ;;  %1051 = vmatprep.subr.bf16.mxu0 %v1193_v14 }
 0x116   : > { %1053 = vmatpush3.bf16.msra.mxu0 %v1052_v29 }
 0x117   : > { %1054 = vmatprep.subr.bf16.mxu0 %v1193_v14 }
 0x11a   : > { %1056 = vmatpush3.bf16.msra.mxu0 %v1055_v33 }
 0x11b   : > { %1057 = vmatprep.subr.bf16.mxu0 %v1193_v14 }
 0x11e   : > { %1059 = vmatpush3.bf16.msra.mxu0 %v1058_v36 }
 0x1de   : > { %v995_v38 = vpop.f32.mrb[0].mxu1 }
 0x1df   : > { %v612_v39 = vadd.f32 %v995_v38, %v909_v37  ;;  %v603_v40 = vpop.f32.mrb[1].mxu1 }
 0x1e0   : > { %v604_v41 = vadd.f32 %v909_v37, %v603_v40  ;;  %v996_v42 = vpop.f32.mrb[2].mxu1 }
 0x1e1   : > { %v920_v43 = vmul.f32 -1.442695, %v612_v39  ;;  %v615_v44 = vadd.f32 %v996_v42, %v909_v37  ;;  %v606_v45 = vpop.f32.mrb[3].mxu1  ;;  %v713_v42 = vld [vmem:[#allocation2] sm:$0x1] }
 0x1e2   : > { %v918_v46 = vmul.f32 -1.442695, %v604_v41  ;;  %v607_v47 = vadd.f32 %v909_v37, %v606_v45  ;;  %v744_v45 = vld [vmem:[%s1366_s6] sm:$0x1] }
 0x1e3   : > { %1133 = vpow2.f32 %v920_v43  ;;  %v921_v48 = vmul.f32 -1.442695, %v615_v44 }
 0x1e4   : > { %1135 = vpow2.f32 %v918_v46  ;;  %v919_v49 = vmul.f32 -1.442695, %v607_v47 }
 0x1e5   : > { %1137 = vpow2.f32 %v921_v48 }
 0x1e6   : > { %1139 = vpow2.f32 %v919_v49  ;;  %v999_v50 = vpop.f32.mrb[4].mxu1 }
 0x1e7   : > { %v628_v51 = vadd.f32 %v999_v50, %v909_v37  ;;  %v619_v52 = vpop.f32.mrb[5].mxu1 }
 0x1e8   : > { %v620_v53 = vadd.f32 %v909_v37, %v619_v52  ;;  %v1000_v54 = vpop.f32.mrb[6].mxu1 }
 0x1e9   : > { %v924_v55 = vmul.f32 -1.442695, %v628_v51  ;;  %v631_v56 = vadd.f32 %v1000_v54, %v909_v37  ;;  %v622_v57 = vpop.f32.mrb[7].mxu1 }
 0x1ea   : > { %v922_v58 = vmul.f32 -1.442695, %v620_v53  ;;  %v623_v59 = vadd.f32 %v909_v37, %v622_v57 }
 0x1eb   : > { %1141 = vpow2.f32 %v924_v55  ;;  %v925_v60 = vmul.f32 -1.442695, %v631_v56 }
 0x1ec   : > { %1143 = vpow2.f32 %v922_v58  ;;  %v923_v61 = vmul.f32 -1.442695, %v623_v59 }
 0x1ed   : > { %v1134_v62 = vpop.eup %1133  ;;  %1145 = vpow2.f32 %v925_v60 }
 0x1ee   : > { %v1136_v63 = vpop.eup %1135  ;;  %v660_v0 = vadd.f32 1.0, %v1134_v62  ;;  %1147 = vpow2.f32 %v923_v61 }
 0x1ef   : > { %v1138_v1 = vpop.eup %1137  ;;  %v658_v2 = vadd.f32 1.0, %v1136_v63 }
 0x1f0   : > { %v1140_v3 = vpop.eup %1139  ;;  %v661_v4 = vadd.f32 1.0, %v1138_v1 }
 0x1f1   : > { %1149 = vrcp.f32 %v658_v2  ;;  %v659_v5 = vadd.f32 1.0, %v1140_v3 }
 0x1f2   : > { %1151 = vrcp.f32 %v660_v0 }
 0x1f3   : > { %1153 = vrcp.f32 %v659_v5 }
 0x1f4   : > { %1155 = vrcp.f32 %v661_v4 }
 0x1f5   : > { %v1142_v6 = vpop.eup %1141 }
 0x1f6   : > { %v1144_v7 = vpop.eup %1143  ;;  %v664_v8 = vadd.f32 1.0, %v1142_v6 }
 0x1f7   : > { %v1146_v9 = vpop.eup %1145  ;;  %v662_v10 = vadd.f32 1.0, %v1144_v7 }
 0x1f8   : > { %v1148_v11 = vpop.eup %1147  ;;  %v665_v12 = vadd.f32 1.0, %v1146_v9 }
 0x1f9   : > { %1157 = vrcp.f32 %v662_v10  ;;  %v663_v13 = vadd.f32 1.0, %v1148_v11 }
 0x1fa   : > { %1159 = vrcp.f32 %v664_v8 }
 0x1fb   : > { %v1150_v14 = vpop.eup %1149  ;;  %1161 = vrcp.f32 %v663_v13 }
 0x1fc   : > { %v1152_v15 = vpop.eup %1151  ;;  %1163 = vrcp.f32 %v665_v12  ;;  %v682_v17 = vmul.f32 %v1150_v14, %v604_v41 }
 0x1fd   : > { %v1154_v16 = vpop.eup %1153  ;;  %v684_v20 = vmul.f32 %v1152_v15, %v612_v39 }
 0x1fe   : > { %v683_v18 = vmul.f32 %v1154_v16, %v607_v47  ;;  %v1156_v19 = vpop.eup %1155 }
 0x1ff   : > { %v685_v22 = vmul.f32 %v1156_v19, %v615_v44 }
 0x200   : > { %v714_v21 = vadd.f32 %v683_v18, %v682_v17 }
 0x202   : > { %v715_v23 = vadd.f32 %v714_v21, %v684_v20 }
 0x203   : > { %v1158_v24 = vpop.eup %1157 }
 0x204   : > { %v1160_v25 = vpop.eup %1159  ;;  %v686_v26 = vmul.f32 %v1158_v24, %v620_v53  ;;  %v716_v27 = vadd.f32 %v715_v23, %v685_v22 }
 0x205   : > { %v1162_v28 = vpop.eup %1161  ;;  %v688_v32 = vmul.f32 %v1160_v25, %v628_v51 }
 0x206   : > { %v717_v29 = vadd.f32 %v716_v27, %v686_v26  ;;  %v687_v30 = vmul.f32 %v1162_v28, %v623_v59  ;;  %v1164_v31 = vpop.eup %1163 }
 0x207   : > { %v689_v34 = vmul.f32 %v1164_v31, %v631_v56 }
 0x208   : > { %v718_v33 = vadd.f32 %v717_v29, %v687_v30 }
 0x20a   : > { %v719_v35 = vadd.f32 %v718_v33, %v688_v32 }
 0x20c   : > { %v720_v36 = vadd.f32 %v719_v35, %v689_v34 }
 0x20e   : > { %v721_v37 = vrot.slane %v720_v36, 4 }
 0x210   : > { %v722_v38 = vadd.f32 %v721_v37, %v720_v36 }
 0x212   : > { %v723_v40 = vrot.slane %v722_v38, 2 }
 0x214   : > { %v724_v39 = vadd.f32 %v723_v40, %v722_v38 }
 0x216   : > { %v725_v41 = vrot.slane %v724_v39, 1 }
 0x218   : > { %v726_v43 = vadd.f32 %v725_v41, %v724_v39 }
 0x21a   : > { %v727_v44 = vadd.f32 %v726_v43, %v713_v42 }
 0x21c   : > { %1034 = vmatmul.mubr.f32.vlgmr.msra.gmra.mrb[8].mxu0 %v727_v44 }
 0x2ef   : > { %v811_v46 = vpop.f32.mrb[8].mxu0 }
 0x2f0   : > { %v812_v47 = vadd.f32 %v811_v46, %v744_v45  ;;  %v1035_v48 = vpop.f32.mrb[9].mxu0 }
 0x2f2   : > { %v926_v49 = vmul.f32 -1.442695, %v812_v47 }
 0x2f4   : > { %1165 = vpow2.f32 %v926_v49 }
 0x2fe   : > { %v1166_v50 = vpop.eup %1165 }
 0x2ff   : > { %v818_v51 = vadd.f32 1.0, %v1166_v50 }
 0x301   : > { %1167 = vrcp.f32 %v818_v51 }
 0x30b   : > { %v1168_v52 = vpop.eup %1167 }
 0x30c   : > { %821 = vst [vmem:[%s302_s12] sm:$0x1] %v1168_v52 }
 0x30d PF: > { %s17_s26 = sadd.s32 1, %s1191_s26   ;;  %s1368_s24 = smov %s1187_s25 }
 0x30e   : > { %p14_p5 = scmp.ge.s32.totalorder %s17_s26, 4   ;;  %s1369_s25 = smov %s1371_s27 }
 0x310   :  { %16 = sbr.rel (!%p14_p5) target bundleno = 2 (0x2), region = 90 }

</bundles_post_ra>
